<compile_context>
chip_gen: v7x
topology: tpu7x:2x2x1
jax: 0.10.0
libtpu: 0.0.40
codegen_flags: <defaults>
</compile_context>

<pallas_src>
import jax
import jax.numpy as jnp
from jax.experimental import pallas as pl
from jax.experimental.pallas import tpu as pltpu


_MiB = 1024 * 1024
# Largest H*W for which the lane-dense path keeps its (H*W, H*W) 0/1 matrix:
# S is at most 4 MiB f32 and the f32 MXU reduction stays under the HBM
# roofline on v5e/v6e/v7x.
_MAX_HW_FOR_MATMUL = 1024


def _round_up(x, m):
    return ((x + m - 1) // m) * m


def _vmem_plan():
    """Returns (pipeline_budget_bytes, vmem_limit_bytes), generation-aware."""
    cap = 0
    try:
        info = pltpu.get_tpu_info()
        cap = int(getattr(info, "vmem_capacity_bytes", 0) or 0)
    except Exception:
        cap = 0
    if cap >= 96 * _MiB:
        # v5e / v6e: 128 MiB physical VMEM per TensorCore.
        return 44 * _MiB, 72 * _MiB
    # v7x (64 MiB physical per TensorCore) or unknown: stay conservative and
    # leave headroom for compiler-internal scratch.
    return 20 * _MiB, 44 * _MiB


def _probably_multi_core():
    """Best-effort 2-TensorCore (megacore) detection; True when unknown."""
    try:
        info = pltpu.get_tpu_info()
        for attr in ("num_cores", "num_tensorcores", "cores_per_chip"):
            v = getattr(info, attr, None)
            if v is not None:
                return int(v) >= 2
    except Exception:
        pass
    try:
        v = getattr(jax.devices()[0], "num_cores", None)
        if v is not None:
            return int(v) >= 2
    except Exception:
        pass
    # Unknown: keep the cap (negligible cost on single-TC chips because the
    # per-step slab stays multi-MiB; required to keep both v7x cores busy).
    return True


def _legalize_rows(b, nc):
    """Clamp row-block size to a legal value (multiple of 8 or full extent)."""
    b = max(1, min(int(b), nc))
    if b >= nc or nc <= 8:
        return nc
    return max(8, (b // 8) * 8)


def _maybe_megacore_cap(b, nc, other_axis_steps):
    # Split the row axis across TensorCores only when it is the sole parallel
    # axis; otherwise keep the biggest slab per step (kernel is HBM-bound).
    if other_axis_steps == 1 and nc >= 16 and _probably_multi_core():
        b = min(b, pl.cdiv(nc, 2))
    return b


def _divisor_lane_tile(w, cap):
    """Largest 128-multiple divisor of w that is <= cap (falls back to 128)."""
    best = 128
    d = 128
    top = min(w, max(int(cap), 128))
    while d <= top:
        if w % d == 0:
            best = d
        d += 128
    return best


def _plan_lane_dense(nc, hw, itemsize, budget):
    """Row-block size for the lane-dense (B, H*W) path (padding-aware)."""
    # The (hw, hw) f32 matrix is resident for the whole call; budget it at two
    # pipeline buffers to be safe.
    budget = max(_MiB, budget - 2 * hw * hw * 4)
    hwp = _round_up(hw, 128)
    # 2 input + 2 output pipeline buffers in the array dtype plus ~4 live
    # block-sized f32 temporaries (upcast x, e, denom, product).
    per_row = hwp * (4 * itemsize + 4 * 4)
    b = max(1, budget // per_row)
    b = _maybe_megacore_cap(b, nc, 1)
    return _legalize_rows(b, nc)


def _plan_sublane_path(nc, h, w, itemsize, budget):
    """(row-block, lane-tile) for the (B, H, TW) sublane-reduce path."""
    hp = _round_up(h, 8)
    per_lane = hp * (4 * itemsize + 4 * 4)
    if w % 128 == 0:
        # Keep every block fully lane-dense and unmasked: tw must divide w.
        max_tw = max(128, budget // (8 * per_lane))   # want b >= 8 rows
        tw = w if w <= max_tw else _divisor_lane_tile(w, max_tw)
    else:
        tw = w                                        # full extent (block rule)
    twp = _round_up(tw, 128)
    b = max(1, budget // (per_lane * twp))
    b = _maybe_megacore_cap(b, nc, pl.cdiv(w, tw))
    b = _legalize_rows(b, nc)
    return b, tw


def _softmax_lane_dense_kernel(x_ref, s_ref, o_ref):
    # x_ref/o_ref: (B, H*W) lane-dense block.  s_ref: (H*W, H*W) 0/1 matrix
    # with S[i, j] = 1 iff i % W == j % W.  Softmax over h for every (row, w).
    x = x_ref[...].astype(jnp.float32)
    # Per-row max over the whole H*W lane axis: valid global stabilizer.
    m = jnp.max(x, axis=1, keepdims=True)                     # XLU lane reduce
    e = jnp.exp(x - m)                                        # EUP
    # denom[:, h*W + w] = sum_h' e[:, h'*W + w]  -- one MXU matmul, already
    # broadcast back to every h.
    denom = jnp.dot(e, s_ref[...], preferred_element_type=jnp.float32)
    inv = pl.reciprocal(denom, approx=True)                   # EUP vrcp
    inv = inv * (2.0 - denom * inv)                           # Newton (VPU)
    o_ref[...] = (e * inv).astype(o_ref.dtype)


def _softmax_sublane_kernel(x_ref, o_ref):
    # x_ref/o_ref: (B, H, TW) block; softmax over axis 1 (sublanes, XLU).
    x = x_ref[...].astype(jnp.float32)
    m = jnp.max(x, axis=1, keepdims=True)
    e = jnp.exp(x - m)
    s = jnp.sum(e, axis=1, keepdims=True)
    inv = pl.reciprocal(s, approx=True)
    inv = inv * (2.0 - s * inv)
    o_ref[...] = (e * inv).astype(o_ref.dtype)


def softmax_conv2d(x):
    """Pallas implementation of SoftmaxConv2d.forward (independent-channels).

    Args:
      x: jnp.ndarray of shape (N, C, H, W), any float dtype.
    Returns:
      jnp.ndarray of shape (N, C, H, W): softmax over the H axis, taken
      independently for every (n, c, w).
    """
    n, c, h, w = x.shape
    nc = n * c
    hw = h * w
    itemsize = jnp.dtype(x.dtype).itemsize
    budget, vmem_limit = _vmem_plan()

    if w < 128 and hw <= _MAX_HW_FOR_MATMUL:
        # --- Lane-dense path (typical conv feature maps, W < 128) ---
        b = _plan_lane_dense(nc, hw, itemsize, budget)
        x_flat = x.reshape(nc, hw)                 # contiguous, free reshape
        col = jnp.arange(hw, dtype=jnp.int32) % w
        same_w = (col[:, None] == col[None, :]).astype(jnp.float32)
        grid = (pl.cdiv(nc, b),)
        out_flat = pl.pallas_call(
            _softmax_lane_dense_kernel,
            out_shape=jax.ShapeDtypeStruct((nc, hw), x.dtype),
            grid_spec=pltpu.PrefetchScalarGridSpec(
                num_scalar_prefetch=0,
                grid=grid,
                in_specs=[
                    pl.BlockSpec((b, hw), lambda i: (i, 0)),
                    # Constant block index -> fetched once, stays resident.
                    pl.BlockSpec((hw, hw), lambda i: (0, 0)),
                ],
                out_specs=pl.BlockSpec((b, hw), lambda i: (i, 0)),
            ),
            compiler_params=pltpu.CompilerParams(
                dimension_semantics=("parallel",),
                vmem_limit_bytes=vmem_limit,
            ),
        )(x_flat, same_w)
        return out_flat.reshape(n, c, h, w)

    # --- Large-W / fallback path: softmax over the sublane (H) axis ---
    # Ragged grids are fine: the softmax is fully independent per (row, lane),
    # so padded garbage never contaminates valid results and out-of-bounds
    # writes are masked on store.
    b, tw = _plan_sublane_path(nc, h, w, itemsize, budget)
    x_flat = x.reshape(nc, h, w)
    grid = (pl.cdiv(nc, b), pl.cdiv(w, tw))
    out_flat = pl.pallas_call(
        _softmax_sublane_kernel,
        out_shape=jax.ShapeDtypeStruct((nc, h, w), x.dtype),
        grid_spec=pltpu.PrefetchScalarGridSpec(
            num_scalar_prefetch=0,
            grid=grid,
            in_specs=[pl.BlockSpec((b, h, tw), lambda i, j: (i, 0, j))],
            out_specs=pl.BlockSpec((b, h, tw), lambda i, j: (i, 0, j)),
        ),
        compiler_params=pltpu.CompilerParams(
            dimension_semantics=("parallel", "parallel"),
            vmem_limit_bytes=vmem_limit,
        ),
    )(x_flat)
    return out_flat.reshape(n, c, h, w)


def _reference(x):
    # Pure-JAX reference matching torch.nn.Softmax(dim=1) on (N*C, H, W).
    n, c, h, w = x.shape
    xf = x.reshape(n * c, h, w).astype(jnp.float32)
    out = jax.nn.softmax(xf, axis=1)
    return out.reshape(n, c, h, w).astype(x.dtype)


def _check(x, atol=1e-4, rtol=1e-4):
    out = jax.block_until_ready(softmax_conv2d(x))
    ref = _reference(x)
    assert out.shape == x.shape and out.dtype == x.dtype
    assert jnp.allclose(out.astype(jnp.float32), ref.astype(jnp.float32),
                        atol=atol, rtol=rtol)
    # Sanity: softmax over H sums to ~1 for every (n, c, w).
    assert jnp.allclose(jnp.sum(out.astype(jnp.float32), axis=2), 1.0,
                        atol=max(atol, 1e-3))
    return out


if __name__ == "__main__":
    key = jax.random.PRNGKey(0)
    k0, k1, k2, k3, k4 = jax.random.split(key, 5)

    # Primary small NCHW input consistent with a conv feature map
    # (lane-dense H*W path, W < 128).
    x = jax.random.normal(k0, (2, 4, 16, 16), dtype=jnp.float32)
    _check(x)

    # W already a multiple of 128: sublane-reduce path, divisor lane tiles.
    x_dense = jax.random.normal(k1, (2, 3, 8, 128), dtype=jnp.float32)
    _check(x_dense)

    # Non-multiple-of-8 fused N*C extent (full-extent row block).
    x_ragged = jax.random.normal(k2, (3, 5, 16, 16), dtype=jnp.float32)
    _check(x_ragged)

    # Odd H, W with H*W not a multiple of 128 (exercises padded lanes and a
    # non-128-aligned matmul contraction).
    x_odd = jax.random.normal(k3, (2, 3, 10, 12), dtype=jnp.float32)
    _check(x_odd)

    # bf16 feature map (output compared at bf16 precision).
    x_bf16 = jax.random.normal(k4, (2, 4, 16, 16), dtype=jnp.bfloat16)
    _check(x_bf16, atol=2e-2, rtol=2e-2)

    # TODO(synk): the `else` branch of the PyTorch forward calls
    # self.softmaxFunction, which is never defined in __init__; only the
    # independent-channels branch is implementable.
    print("KERNEL_OK")
</pallas_src>

<mosaic_0001>
module attributes {stable_mosaic.version = 11 : i64} {
  func.func @_softmax_lane_dense_kernel(%arg0: i32, %arg1: memref<8x256xf32, #tpu.memory_space<vmem>>, %arg2: memref<256x256xf32, #tpu.memory_space<vmem>>, %arg3: memref<8x256xf32, #tpu.memory_space<vmem>>) attributes {dimension_semantics = [#tpu.dimension_semantics<parallel>], iteration_bounds = array<i64: 1>, scalar_prefetch = 0 : i64, scratch_operands = 0 : i64, tpu.core_type = #tpu.core_type<tc>, window_params = [{transform_indices = @transform_0, window_bounds = array<i64: 8, 256>}, {pipeline_mode = #tpu.pipeline_mode<synchronous>, transform_indices = @transform_1, window_bounds = array<i64: 256, 256>}, {transform_indices = @transform_2, window_bounds = array<i64: 8, 256>}]} {
    %c0 = arith.constant 0 : index
    %c0_0 = arith.constant 0 : index
    %0 = vector.load %arg1[%c0, %c0_0] : memref<8x256xf32, #tpu.memory_space<vmem>>, vector<8x256xf32>
    %cst = arith.constant dense<0xFF800000> : vector<8xf32>
    %1 = vector.multi_reduction <maximumf>, %0, %cst [1] : vector<8x256xf32> to vector<8xf32>
    %2 = vector.shape_cast %1 : vector<8xf32> to vector<8x1xf32>
    %3 = vector.broadcast %2 : vector<8x1xf32> to vector<8x256xf32>
    %4 = arith.subf %0, %3 : vector<8x256xf32>
    %5 = math.exp %4 : vector<8x256xf32>
    %c0_1 = arith.constant 0 : index
    %c0_2 = arith.constant 0 : index
    %6 = vector.load %arg2[%c0_1, %c0_2] : memref<256x256xf32, #tpu.memory_space<vmem>>, vector<256x256xf32>
    %cst_3 = arith.constant dense<0.000000e+00> : vector<8x256xf32>
    %7 = tpu.matmul %5, %6, %cst_3 {dimension_numbers = #tpu.dot_dimension_numbers<[1], [0], [0], [1], [0, 0, 1, 1], [], []>} : vector<8x256xf32>, vector<256x256xf32>, vector<8x256xf32> -> vector<8x256xf32>
    %8 = tpu.reciprocal %7 {approx = true} : vector<8x256xf32> -> vector<8x256xf32>
    %9 = arith.mulf %7, %8 : vector<8x256xf32>
    %cst_4 = arith.constant 2.000000e+00 : f32
    %10 = vector.broadcast %cst_4 : f32 to vector<8x256xf32>
    %11 = arith.subf %10, %9 : vector<8x256xf32>
    %12 = arith.mulf %8, %11 : vector<8x256xf32>
    %13 = arith.mulf %5, %12 : vector<8x256xf32>
    %c0_5 = arith.constant 0 : index
    %c0_6 = arith.constant 0 : index
    %14 = vector.load %arg3[%c0_5, %c0_6] : memref<8x256xf32, #tpu.memory_space<vmem>>, vector<8x256xf32>
    tpu.vector_store %arg3[%c0_5, %c0_6], %13 {strides = array<i32>} : memref<8x256xf32, #tpu.memory_space<vmem>>, vector<8x256xf32>,
    return
  }
  func.func @transform_0(%arg0: i32) -> (i32, i32) {
    %c0_i32 = arith.constant 0 : i32
    %c0_i32_0 = arith.constant 0 : i32
    return %arg0, %c0_i32 : i32, i32
  }
  func.func @transform_1(%arg0: i32) -> (i32, i32) {
    %c0_i32 = arith.constant 0 : i32
    %c0_i32_0 = arith.constant 0 : i32
    %c0_i32_1 = arith.constant 0 : i32
    return %c0_i32, %c0_i32_0 : i32, i32
  }
  func.func @transform_2(%arg0: i32) -> (i32, i32) {
    %c0_i32 = arith.constant 0 : i32
    %c0_i32_0 = arith.constant 0 : i32
    return %arg0, %c0_i32 : i32, i32
  }
}

</mosaic_0001>

<bundles_post_ra>
// kernel: tpu_custom_call.1
= control target key start
LH: loop header
LB: loop body
LE: loop exit
PB: predicated region body
PF: predicated region fallthrough
CT: control target
= control target key end

     0   :  { %7 = vsyncpa [#allocation3], 0  ;;  %s432_s0 = inlined_call_operand.hbm [shape: f32[8,256], index: 0, kind: input, shape index: {}]   ;;  %s433_s1 = inlined_call_operand.hbm [shape: f32[256,256], index: 1, kind: input, shape index: {}]   ;;  %s434_s2 = inlined_call_operand.hbm [shape: f32[8,256], index: 2, kind: output, shape index: {}]  }
   0x1   :  { %8 = vsyncpa [#allocation6], 0 }
   0x2   :  { %9 = vsyncpa [#allocation4], 0  ;;  %s361_s9 = smov [#allocation2]   ;;  %s362_s11 = smov [#allocation5]  }
   0x3   :  { %s16_s10 = sshll.u32 %s361_s9, 4  ;;  %s25_s12 = sshll.u32 %s362_s11, 4  ;;  %s17_s10 = int_to_ptr.vmem [resolvable:$true] %s16_s10  ;;  %s381_s12 = int_to_ptr.vmem [resolvable:$true] %s25_s12 }
   0x4   :  { %s289_s15 = scalar_lea.hbm %s432_s0, 256 }
   0x5   :  { %p290_p0 = scmp.ne.s32.totalorder %s432_s0, %s289_s15  ;;  %p293_p1 = scmp.lt.u32.totalorder %s289_s15, %s432_s0 }
   0x7   :  { %p295_p2 = pnand %p293_p1, %p290_p0 }
   0x9   :  { %298 = shalt.err (!%p295_p2)
}
   0xa   :  { %s299_s20 = scalar_lea.vmem %s17_s10, 256  ;;  %p304_p4 = scmp.lt.s32.totalorder %s17_s10, %s17_s10 }
   0xb   :  { %p300_p3 = scmp.ne.s32.totalorder %s17_s10, %s299_s20  ;;  %p305_p5 = scmp.lt.s32.totalorder %s299_s20, %s299_s20 }
   0xd   :  { %p306_p6 = por %p305_p5, %p304_p4 }
   0xf   :  { %p307_p7 = pnand %p306_p6, %p300_p3 }
  0x11   :  { %310 = shalt.err (!%p307_p7)
}
  0x12   :  { %19 = dma.hbm_to_vmem [thread:$0]  %s432_s0, 256, %s17_s10, [#allocation3]  }
  0x13   :  { %s311_s25 = scalar_lea.hbm %s433_s1, 8192 }
  0x14   :  { %p312_p8 = scmp.ne.s32.totalorder %s433_s1, %s311_s25  ;;  %p315_p9 = scmp.lt.u32.totalorder %s311_s25, %s433_s1 }
  0x16   :  { %p317_p10 = pnand %p315_p9, %p312_p8 }
  0x18   :  { %320 = shalt.err (!%p317_p10)
}
  0x19   :  { %s321_s30 = scalar_lea.vmem %s381_s12, 8192  ;;  %p326_p12 = scmp.lt.s32.totalorder %s381_s12, %s381_s12 }
  0x1a   :  { %p322_p11 = scmp.ne.s32.totalorder %s381_s12, %s321_s30  ;;  %p327_p13 = scmp.lt.s32.totalorder %s321_s30, %s321_s30 }
  0x1c   :  { %p328_p0 = por %p327_p13, %p326_p12 }
  0x1e   :  { %p329_p1 = pnand %p328_p0, %p322_p11 }
  0x20   :  { %332 = shalt.err (!%p329_p1)
}
  0x21   :  { %s363_s0 = smov 256   ;;  %s364_s3 = smov 16  }
  0x22   :  { %31 = dma.hbm_to_vmem [thread:$0]  %s433_s1, 8192, %s381_s12, [#allocation6], %s363_s0, %s363_s0, %s364_s3  }
  0x23   :  { %355 = dma.done.wait [#allocation3], 256  }
  0x24   :  { %356 = vsyncadd [#allocation3], 4294967040 }
  0x25   :  { %357 = dma.done.wait [#allocation6], 8192  }
  0x26   :  { %358 = vsyncadd [#allocation6], 4294959104  ;;  %v412_v0 = vld [vmem:[#allocation2] sm:$0xff]  ;;  %v414_v1 = vld [vmem:[#allocation2 + $0x8] sm:$0xff]  ;;  %s365_s1 = smov [#allocation7]  }
  0x27   :  { %v50_v2 = vld [vmem:[#allocation5 + $0x8] sm:$0xff]  ;;  %v40_v3 = vmax.f32 %v412_v0, %v414_v1  ;;  %v52_v4 = vld [vmem:[#allocation5 + $0x18] sm:$0xff]  ;;  %v49_v5 = vld [vmem:[#allocation5] sm:$0xff]  ;;  %s202_s6 = sshll.u32 %s365_s1, 4  ;;  %s203_s6 = int_to_ptr.vmem [resolvable:$true] %s202_s6 }
  0x28   :  { %v51_v6 = vld [vmem:[#allocation5 + $0x10] sm:$0xff]  ;;  %v212_v7 = vpack.c.bf16 %v52_v4, %v50_v2  ;;  %v54_v9 = vld [vmem:[#allocation5 + $0x28] sm:$0xff]  ;;  %v56_v10 = vld [vmem:[#allocation5 + $0x38] sm:$0xff]  ;;  %s333_s7 = scalar_lea.vmem %s203_s6, 256  ;;  %p338_p3 = scmp.lt.s32.totalorder %s203_s6, %s203_s6 }
  0x29   :  { %v214_v8 = vpack.c.bf16 %v51_v6, %v49_v5  ;;  %v53_v11 = vld [vmem:[#allocation5 + $0x20] sm:$0xff]  ;;  %41 = vmax.xlane.f32.xlu0 %v40_v3  ;;  %v216_v12 = vpack.c.bf16 %v56_v10, %v54_v9  ;;  %v55_v13 = vld [vmem:[#allocation5 + $0x30] sm:$0xff]  ;;  %v58_v14 = vld [vmem:[#allocation5 + $0x48] sm:$0xff]  ;;  %p334_p2 = scmp.ne.s32.totalorder %s203_s6, %s333_s7  ;;  %p339_p4 = scmp.lt.s32.totalorder %s333_s7, %s333_s7 }
  0x2a   :  { %v60_v15 = vld [vmem:[#allocation5 + $0x58] sm:$0xff]  ;;  %213 = vmatprep.subr.bf16.mxu0 %v212_v7  ;;  %v218_v16 = vpack.c.bf16 %v55_v13, %v53_v11  ;;  %v57_v18 = vld [vmem:[#allocation5 + $0x40] sm:$0xff]  ;;  %v59_v19 = vld [vmem:[#allocation5 + $0x50] sm:$0xff] }
  0x2b   :  { %215 = vmatpush1.bf16.msra.mxu0 %v214_v8  ;;  %v220_v17 = vpack.c.bf16 %v60_v15, %v58_v14  ;;  %v62_v20 = vld [vmem:[#allocation5 + $0x68] sm:$0xff]  ;;  %v64_v21 = vld [vmem:[#allocation5 + $0x78] sm:$0xff]  ;;  %v222_v22 = vpack.c.bf16 %v59_v19, %v57_v18  ;;  %v61_v24 = vld [vmem:[#allocation5 + $0x60] sm:$0xff]  ;;  %p340_p5 = por %p339_p4, %p338_p3 }
  0x2c   :  { %217 = vmatprep.subr.bf16.mxu0 %v216_v12  ;;  %v224_v23 = vpack.c.bf16 %v64_v21, %v62_v20  ;;  %v63_v25 = vld [vmem:[#allocation5 + $0x70] sm:$0xff]  ;;  %v66_v26 = vld [vmem:[#allocation5 + $0x88] sm:$0xff]  ;;  %v68_v27 = vld [vmem:[#allocation5 + $0x98] sm:$0xff] }
  0x2d   :  { %v226_v28 = vpack.c.bf16 %v63_v25, %v61_v24  ;;  %v228_v29 = vpack.c.bf16 %v68_v27, %v66_v26  ;;  %v65_v30 = vld [vmem:[#allocation5 + $0x80] sm:$0xff]  ;;  %v67_v31 = vld [vmem:[#allocation5 + $0x90] sm:$0xff]  ;;  %v70_v32 = vld [vmem:[#allocation5 + $0xa8] sm:$0xff]  ;;  %p341_p6 = pnand %p340_p5, %p334_p2 }
  0x2e   :  { %v72_v33 = vld [vmem:[#allocation5 + $0xb8] sm:$0xff]  ;;  %v230_v34 = vpack.c.bf16 %v67_v31, %v65_v30  ;;  %v69_v36 = vld [vmem:[#allocation5 + $0xa0] sm:$0xff]  ;;  %v71_v37 = vld [vmem:[#allocation5 + $0xb0] sm:$0xff] }
  0x2f   :  { %219 = vmatpush1.bf16.msra.mxu0 %v218_v16  ;;  %v232_v35 = vpack.c.bf16 %v72_v33, %v70_v32  ;;  %v74_v38 = vld [vmem:[#allocation5 + $0xc8] sm:$0xff]  ;;  %v76_v39 = vld [vmem:[#allocation5 + $0xd8] sm:$0xff]  ;;  %v234_v40 = vpack.c.bf16 %v71_v37, %v69_v36  ;;  %v73_v42 = vld [vmem:[#allocation5 + $0xc0] sm:$0xff] }
  0x30   :  { %221 = vmatprep.subr.bf16.mxu0 %v220_v17  ;;  %v236_v41 = vpack.c.bf16 %v76_v39, %v74_v38  ;;  %v75_v43 = vld [vmem:[#allocation5 + $0xd0] sm:$0xff]  ;;  %v78_v44 = vld [vmem:[#allocation5 + $0xe8] sm:$0xff]  ;;  %v80_v45 = vld [vmem:[#allocation5 + $0xf8] sm:$0xff] }
  0x31   :  { %v238_v46 = vpack.c.bf16 %v75_v43, %v73_v42  ;;  %v240_v47 = vpack.c.bf16 %v80_v45, %v78_v44  ;;  %v77_v48 = vld [vmem:[#allocation5 + $0xe0] sm:$0xff]  ;;  %v79_v49 = vld [vmem:[#allocation5 + $0xf0] sm:$0xff]  ;;  %v82_v50 = vld [vmem:[#allocation5 + $0x108] sm:$0xff] }
  0x32   :  { %v84_v51 = vld [vmem:[#allocation5 + $0x118] sm:$0xff]  ;;  %v242_v52 = vpack.c.bf16 %v79_v49, %v77_v48  ;;  %v81_v54 = vld [vmem:[#allocation5 + $0x100] sm:$0xff]  ;;  %v83_v55 = vld [vmem:[#allocation5 + $0x110] sm:$0xff] }
  0x33   :  { %223 = vmatpush1.bf16.msra.mxu0 %v222_v22  ;;  %v244_v53 = vpack.c.bf16 %v84_v51, %v82_v50  ;;  %v86_v56 = vld [vmem:[#allocation5 + $0x128] sm:$0xff]  ;;  %v88_v57 = vld [vmem:[#allocation5 + $0x138] sm:$0xff]  ;;  %v246_v58 = vpack.c.bf16 %v83_v55, %v81_v54  ;;  %v85_v60 = vld [vmem:[#allocation5 + $0x120] sm:$0xff] }
  0x34   :  { %225 = vmatprep.subr.bf16.mxu0 %v224_v23  ;;  %v248_v59 = vpack.c.bf16 %v88_v57, %v86_v56  ;;  %v87_v61 = vld [vmem:[#allocation5 + $0x130] sm:$0xff]  ;;  %v90_v62 = vld [vmem:[#allocation5 + $0x148] sm:$0xff]  ;;  %v92_v63 = vld [vmem:[#allocation5 + $0x158] sm:$0xff] }
  0x35   :  { %v250_v2 = vpack.c.bf16 %v87_v61, %v85_v60  ;;  %v252_v3 = vpack.c.bf16 %v92_v63, %v90_v62  ;;  %v89_v4 = vld [vmem:[#allocation5 + $0x140] sm:$0xff]  ;;  %v91_v5 = vld [vmem:[#allocation5 + $0x150] sm:$0xff]  ;;  %v94_v6 = vld [vmem:[#allocation5 + $0x168] sm:$0xff] }
  0x36   :  { %v96_v7 = vld [vmem:[#allocation5 + $0x178] sm:$0xff]  ;;  %v254_v8 = vpack.c.bf16 %v91_v5, %v89_v4  ;;  %v93_v10 = vld [vmem:[#allocation5 + $0x160] sm:$0xff]  ;;  %v95_v11 = vld [vmem:[#allocation5 + $0x170] sm:$0xff] }
  0x37   :  { %227 = vmatpush1.bf16.msra.mxu0 %v226_v28  ;;  %v256_v9 = vpack.c.bf16 %v96_v7, %v94_v6  ;;  %v98_v12 = vld [vmem:[#allocation5 + $0x188] sm:$0xff]  ;;  %v100_v13 = vld [vmem:[#allocation5 + $0x198] sm:$0xff]  ;;  %v258_v14 = vpack.c.bf16 %v95_v11, %v93_v10  ;;  %v97_v16 = vld [vmem:[#allocation5 + $0x180] sm:$0xff] }
  0x38   :  { %229 = vmatprep.subr.bf16.mxu0 %v228_v29  ;;  %v260_v15 = vpack.c.bf16 %v100_v13, %v98_v12  ;;  %v99_v17 = vld [vmem:[#allocation5 + $0x190] sm:$0xff]  ;;  %v102_v18 = vld [vmem:[#allocation5 + $0x1a8] sm:$0xff]  ;;  %v104_v19 = vld [vmem:[#allocation5 + $0x1b8] sm:$0xff] }
  0x39   :  { %v262_v20 = vpack.c.bf16 %v99_v17, %v97_v16  ;;  %v264_v21 = vpack.c.bf16 %v104_v19, %v102_v18  ;;  %v101_v22 = vld [vmem:[#allocation5 + $0x1a0] sm:$0xff]  ;;  %v103_v23 = vld [vmem:[#allocation5 + $0x1b0] sm:$0xff]  ;;  %v106_v24 = vld [vmem:[#allocation5 + $0x1c8] sm:$0xff] }
  0x3a   :  { %v108_v25 = vld [vmem:[#allocation5 + $0x1d8] sm:$0xff]  ;;  %v266_v26 = vpack.c.bf16 %v103_v23, %v101_v22  ;;  %v105_v28 = vld [vmem:[#allocation5 + $0x1c0] sm:$0xff]  ;;  %v107_v29 = vld [vmem:[#allocation5 + $0x1d0] sm:$0xff] }
  0x3b   :  { %231 = vmatpush1.bf16.msra.mxu0 %v230_v34  ;;  %v268_v27 = vpack.c.bf16 %v108_v25, %v106_v24  ;;  %v110_v30 = vld [vmem:[#allocation5 + $0x1e8] sm:$0xff]  ;;  %v112_v31 = vld [vmem:[#allocation5 + $0x1f8] sm:$0xff]  ;;  %v270_v32 = vpack.c.bf16 %v107_v29, %v105_v28  ;;  %v109_v34 = vld [vmem:[#allocation5 + $0x1e0] sm:$0xff] }
  0x3c   :  { %233 = vmatprep.subr.bf16.mxu0 %v232_v35  ;;  %v272_v33 = vpack.c.bf16 %v112_v31, %v110_v30  ;;  %v111_v35 = vld [vmem:[#allocation5 + $0x1f0] sm:$0xff] }
  0x3d   :  { %v274_v36 = vpack.c.bf16 %v111_v35, %v109_v34 }
  0x3f   :  { %235 = vmatpush1.bf16.msra.mxu0 %v234_v40 }
  0x40   :  { %237 = vmatprep.subr.bf16.mxu0 %v236_v41 }
  0x43   :  { %239 = vmatpush1.bf16.msra.mxu0 %v238_v46 }
  0x44   :  { %241 = vmatprep.subr.bf16.mxu0 %v240_v47 }
  0x47   :  { %243 = vmatpush1.bf16.msra.mxu0 %v242_v52 }
  0x48   :  { %245 = vmatprep.subr.bf16.mxu0 %v244_v53 }
  0x4b   :  { %247 = vmatpush1.bf16.msra.mxu0 %v246_v58 }
  0x4c   :  { %249 = vmatprep.subr.bf16.mxu0 %v248_v59 }
  0x4f   :  { %251 = vmatpush1.bf16.msra.mxu0 %v250_v2 }
  0x50   :  { %253 = vmatprep.subr.bf16.mxu0 %v252_v3 }
  0x53   :  { %255 = vmatpush1.bf16.msra.mxu0 %v254_v8 }
  0x54   :  { %257 = vmatprep.subr.bf16.mxu0 %v256_v9 }
  0x57   :  { %259 = vmatpush1.bf16.msra.mxu0 %v258_v14 }
  0x58   :  { %261 = vmatprep.subr.bf16.mxu0 %v260_v15 }
  0x5b   :  { %263 = vmatpush1.bf16.msra.mxu0 %v262_v20 }
  0x5c   :  { %265 = vmatprep.subr.bf16.mxu0 %v264_v21 }
  0x5f   :  { %267 = vmatpush1.bf16.msra.mxu0 %v266_v26 }
  0x60   :  { %269 = vmatprep.subr.bf16.mxu0 %v268_v27 }
  0x63   :  { %271 = vmatpush1.bf16.msra.mxu0 %v270_v32 }
  0x64   :  { %273 = vmatprep.subr.bf16.mxu0 %v272_v33 }
  0x67   :  { %275 = vmatpush1.bf16.msra.mxu0 %v274_v36 }
  0xb6   :  { %v42_v37 = vpop.xlane.xlu0 %41 }
  0xb7   :  { %v43_v38 = vsub.f32 %v412_v0, %v42_v37  ;;  %v44_v39 = vsub.f32 %v414_v1, %v42_v37 }
  0xb9   :  { %v45_v40 = vmul.f32 1.442695, %v43_v38  ;;  %v47_v41 = vmul.f32 1.442695, %v44_v39 }
  0xbb   :  { %281 = vpow2.f32 %v45_v40 }
  0xbc   :  { %283 = vpow2.f32 %v47_v41 }
  0xc5   :  { %v282_v42 = vpop.eup %281 }
  0xc6   :  { %v284_v43 = vpop.eup %283 }
  0xc7   :  { %177 = vmatprep.mubr.f32.mxu0 %v284_v43 }
  0xc8   :  { %178 = vmatmul.mubr.f32.vlgmr.msra.gmra.mrb[0].mxu0 %v282_v42 }
 0x19b   :  { %v179_v44 = vpop.f32.mrb[0].mxu0 }
 0x19c   :  { %285 = vrcp.f32 %v179_v44  ;;  %v181_v45 = vpop.f32.mrb[1].mxu0 }
 0x19d   :  { %287 = vrcp.f32 %v181_v45 }
 0x1a6   :  { %v286_v46 = vpop.eup %285 }
 0x1a7   :  { %v288_v47 = vpop.eup %287  ;;  %v186_v48 = vmul.f32 %v286_v46, %v179_v44 }
 0x1a8   :  { %v187_v49 = vmul.f32 %v288_v47, %v181_v45 }
 0x1a9   :  { %v188_v50 = vsub.f32 2.0, %v186_v48 }
 0x1aa   :  { %v189_v0 = vsub.f32 2.0, %v187_v49 }
 0x1ab   :  { %v190_v51 = vmul.f32 %v286_v46, %v188_v50 }
 0x1ac   :  { %v191_v1 = vmul.f32 %v288_v47, %v189_v0 }
 0x1ad   :  { %v192_v52 = vmul.f32 %v282_v42, %v190_v51 }
 0x1ae   :  { %v193_v53 = vmul.f32 %v284_v43, %v191_v1 }
 0x1af   :  { %194 = vst [vmem:[#allocation7] sm:$0xff] %v192_v52 }
 0x1b0   :  { %195 = vst [vmem:[#allocation7 + $0x8] sm:$0xff] %v193_v53 }
 0x1b1   :  { %344 = shalt.err (!%p341_p6)
}
 0x1b2   :  { %s345_s10 = scalar_lea.hbm %s434_s2, 256 }
 0x1b3   :  { %p346_p7 = scmp.ne.s32.totalorder %s434_s2, %s345_s10  ;;  %p349_p8 = scmp.lt.u32.totalorder %s345_s10, %s434_s2 }
 0x1b5   :  { %p351_p9 = pnand %p349_p8, %p346_p7 }
 0x1b7   :  { %354 = shalt.err (!%p351_p9)
}
 0x1b8   :  { %205 = dma.vmem_to_hbm [thread:$0]  %s203_s6, 256, %s434_s2, [#allocation4]  }
 0x1b9   :  { %359 = dma.done.wait [#allocation4], 256  }
 0x1ba   :  { %360 = vsyncadd [#allocation4], 4294967040 }
 0x1bb   :  { %209 = vsyncpa [#allocation3], 1 }
 0x1bc   :  { %210 = vsyncpa [#allocation6], 1 }
 0x1bd   :  { %211 = vsyncpa [#allocation4], 1 }

</bundles_post_ra>
